<compile_context>
chip_gen: v6e
topology: v6e:2x2x1
jax: 0.10.0
libtpu: 0.0.40
codegen_flags: <defaults>
</compile_context>

<pallas_src>
import jax
import jax.numpy as jnp
from jax.experimental import pallas as pl
from jax.experimental.pallas import tpu as pltpu

STATE_DIM = 4     # CartPole observation dim
ACTION_DIM = 2    # CartPole action dim
HIDDEN = 128
OUT_ROWS = 8      # sublane-aligned padded output rows (rows 0..1 are real)
LANE = 128


def dqn_kernel(x_ref, w1_ref, b1_ref, w2_ref, b2_ref, o_ref):
    # x_ref:  (STATE_DIM, tb)   -- batch on the lane axis
    # w1_ref: (HIDDEN, STATE_DIM)
    # b1_ref: (HIDDEN, 1)
    # w2_ref: (OUT_ROWS, HIDDEN)  (zero-padded rows ACTION_DIM..OUT_ROWS-1)
    # b2_ref: (OUT_ROWS, 1)
    # o_ref:  (OUT_ROWS, tb)
    tb = o_ref.shape[1]

    # Layer 1 on the VPU: K=4 contraction as 4 broadcast-FMAs.  Bias
    # initializes the accumulator (single broadcast, hoisted out of the loop).
    h = jnp.broadcast_to(b1_ref[...], (HIDDEN, tb))
    for k in range(STATE_DIM):                       # static unroll, K=4
        h = h + w1_ref[:, k:k + 1] * x_ref[k:k + 1, :]
    h = jnp.maximum(h, 0.0)                          # ReLU, (HIDDEN, tb)

    # Layer 2 on the MXU: (8,128) @ (128,tb) -> lane-dense (8,tb) output tile.
    out = jnp.dot(w2_ref[...], h,
                  preferred_element_type=jnp.float32,
                  precision=jax.lax.Precision.HIGHEST)
    o_ref[...] = (out + b2_ref[...]).astype(o_ref.dtype)


def prepare_params(w1, b1, w2, b2):
    """One-time param prep (transpose + zero-pad), hoisted out of the forward.

    w1: (STATE_DIM, HIDDEN), b1: (1, HIDDEN), w2: (HIDDEN, ACTION_DIM),
    b2: (1, ACTION_DIM)  ->  transposed/padded params for the kernel."""
    w1_t = jnp.asarray(w1).T                                   # (HIDDEN, STATE_DIM)
    b1_t = jnp.asarray(b1).reshape(HIDDEN, 1)                  # (HIDDEN, 1)
    w2_t = jnp.pad(jnp.asarray(w2).T,
                   ((0, OUT_ROWS - ACTION_DIM), (0, 0)))       # (OUT_ROWS, HIDDEN)
    b2_t = jnp.pad(jnp.asarray(b2).reshape(ACTION_DIM, 1),
                   ((0, OUT_ROWS - ACTION_DIM), (0, 0)))       # (OUT_ROWS, 1)
    return w1_t, b1_t, w2_t, b2_t


def dqn_forward(x, params_t, *, tb=1024):
    """x: (B, STATE_DIM) f32, params_t from prepare_params -> (B, ACTION_DIM)."""
    w1_t, b1_t, w2_t, b2_t = params_t
    B = x.shape[0]

    # Batch tile: multiple of 128 (lane axis).  Cap at half the lane-aligned
    # batch whenever possible so the grid has >= 2 steps (v7x megacore split).
    tb = max(LANE, (tb // LANE) * LANE)
    b_ceil = ((B + LANE - 1) // LANE) * LANE
    if b_ceil >= 2 * LANE:
        tb = min(tb, (b_ceil // 2 // LANE) * LANE)
    else:
        tb = LANE
    Bp = ((B + tb - 1) // tb) * tb

    # Lane-dense transposed input: (STATE_DIM, Bp).  Padded batch columns
    # produce junk that is sliced off below.
    x_t = jnp.pad(x, ((0, Bp - B), (0, 0))).T

    out_t = pl.pallas_call(
        dqn_kernel,
        out_shape=jax.ShapeDtypeStruct((OUT_ROWS, Bp), jnp.float32),
        grid=(Bp // tb,),
        in_specs=[
            pl.BlockSpec((STATE_DIM, tb), lambda i: (0, i)),       # x_t (tiled)
            pl.BlockSpec((HIDDEN, STATE_DIM), lambda i: (0, 0)),   # w1_t resident
            pl.BlockSpec((HIDDEN, 1), lambda i: (0, 0)),           # b1_t resident
            pl.BlockSpec((OUT_ROWS, HIDDEN), lambda i: (0, 0)),    # w2_t resident
            pl.BlockSpec((OUT_ROWS, 1), lambda i: (0, 0)),         # b2_t resident
        ],
        out_specs=pl.BlockSpec((OUT_ROWS, tb), lambda i: (0, i)),
        compiler_params=pltpu.CompilerParams(
            dimension_semantics=("parallel",),  # megacore split on v7x
        ),
    )(x_t, w1_t, b1_t, w2_t, b2_t)

    # Slice off the padded rows / batch columns and restore (B, ACTION_DIM).
    return out_t[:ACTION_DIM, :B].T


def init_params(key):
    """Deterministic init mimicking PyTorch nn.Linear default (+/- 1/sqrt(fan_in))."""
    k1, k2, k3, k4 = jax.random.split(key, 4)
    bound1 = 1.0 / jnp.sqrt(STATE_DIM)
    bound2 = 1.0 / jnp.sqrt(HIDDEN)
    # Stored as (in, out) == W.T relative to PyTorch's (out, in).
    w1 = jax.random.uniform(k1, (STATE_DIM, HIDDEN), jnp.float32, -bound1, bound1)
    b1 = jax.random.uniform(k2, (1, HIDDEN), jnp.float32, -bound1, bound1)
    w2 = jax.random.uniform(k3, (HIDDEN, ACTION_DIM), jnp.float32, -bound2, bound2)
    b2 = jax.random.uniform(k4, (1, ACTION_DIM), jnp.float32, -bound2, bound2)
    return w1, b1, w2, b2


def reference_forward(x, w1, b1, w2, b2):
    h = jnp.maximum(
        jnp.dot(x, w1, precision=jax.lax.Precision.HIGHEST) + b1, 0.0)
    return jnp.dot(h, w2, precision=jax.lax.Precision.HIGHEST) + b2


if __name__ == "__main__":
    key = jax.random.PRNGKey(0)
    kx, kx2, kp = jax.random.split(key, 3)
    w1, b1, w2, b2 = init_params(kp)
    params_t = prepare_params(w1, b1, w2, b2)   # one-time prep, hoisted

    # Small batch of CartPole states (original use case).
    B = 8
    x = jax.random.normal(kx, (B, STATE_DIM), jnp.float32)
    out = jax.block_until_ready(dqn_forward(x, params_t))
    ref = reference_forward(x, w1, b1, w2, b2)
    assert out.shape == (B, ACTION_DIM)
    assert jnp.allclose(out, ref, atol=1e-4, rtol=1e-4), "mismatch vs reference (B=8)"

    # Larger ragged batch exercising grid > 1 (megacore split) + padding path.
    B2 = 300
    x2 = jax.random.normal(kx2, (B2, STATE_DIM), jnp.float32)
    out2 = jax.block_until_ready(dqn_forward(x2, params_t))
    ref2 = reference_forward(x2, w1, b1, w2, b2)
    assert out2.shape == (B2, ACTION_DIM)
    assert jnp.allclose(out2, ref2, atol=1e-4, rtol=1e-4), "mismatch vs reference (B=300)"

    print("KERNEL_OK")
</pallas_src>

<mosaic_0001>
module attributes {stable_mosaic.version = 11 : i64} {
  func.func @dqn_kernel(%arg0: i32, %arg1: memref<4x128xf32, #tpu.memory_space<vmem>>, %arg2: memref<128x4xf32, #tpu.memory_space<vmem>>, %arg3: memref<128x1xf32, #tpu.memory_space<vmem>>, %arg4: memref<8x128xf32, #tpu.memory_space<vmem>>, %arg5: memref<8x1xf32, #tpu.memory_space<vmem>>, %arg6: memref<8x128xf32, #tpu.memory_space<vmem>>) attributes {dimension_semantics = [#tpu.dimension_semantics<parallel>], iteration_bounds = array<i64: 1>, scalar_prefetch = 0 : i64, scratch_operands = 0 : i64, tpu.core_type = #tpu.core_type<tc>, window_params = [{transform_indices = @transform_0, window_bounds = array<i64: 4, 128>}, {pipeline_mode = #tpu.pipeline_mode<synchronous>, transform_indices = @transform_1, window_bounds = array<i64: 128, 4>}, {pipeline_mode = #tpu.pipeline_mode<synchronous>, transform_indices = @transform_2, window_bounds = array<i64: 128, 1>}, {pipeline_mode = #tpu.pipeline_mode<synchronous>, transform_indices = @transform_3, window_bounds = array<i64: 8, 128>}, {pipeline_mode = #tpu.pipeline_mode<synchronous>, transform_indices = @transform_4, window_bounds = array<i64: 8, 1>}, {transform_indices = @transform_5, window_bounds = array<i64: 8, 128>}]} {
    %c0 = arith.constant 0 : index
    %c0_0 = arith.constant 0 : index
    %0 = vector.load %arg3[%c0, %c0_0] : memref<128x1xf32, #tpu.memory_space<vmem>>, vector<128x1xf32>
    %1 = vector.shape_cast %0 : vector<128x1xf32> to vector<128x1xf32>
    %2 = vector.broadcast %1 : vector<128x1xf32> to vector<128x128xf32>
    %c0_1 = arith.constant 0 : index
    %c0_2 = arith.constant 0 : index
    %3 = vector.load %arg2[%c0_1, %c0_2] : memref<128x4xf32, #tpu.memory_space<vmem>>, vector<128x1xf32>
    %c0_3 = arith.constant 0 : index
    %c0_4 = arith.constant 0 : index
    %4 = vector.load %arg1[%c0_3, %c0_4] : memref<4x128xf32, #tpu.memory_space<vmem>>, vector<1x128xf32>
    %5 = vector.broadcast %3 : vector<128x1xf32> to vector<128x128xf32>
    %6 = vector.broadcast %4 : vector<1x128xf32> to vector<128x128xf32>
    %7 = arith.mulf %5, %6 : vector<128x128xf32>
    %8 = arith.addf %2, %7 : vector<128x128xf32>
    %c0_5 = arith.constant 0 : index
    %c1 = arith.constant 1 : index
    %9 = vector.load %arg2[%c0_5, %c1] : memref<128x4xf32, #tpu.memory_space<vmem>>, vector<128x1xf32>
    %c1_6 = arith.constant 1 : index
    %c0_7 = arith.constant 0 : index
    %10 = vector.load %arg1[%c1_6, %c0_7] : memref<4x128xf32, #tpu.memory_space<vmem>>, vector<1x128xf32>
    %11 = vector.broadcast %9 : vector<128x1xf32> to vector<128x128xf32>
    %12 = vector.broadcast %10 : vector<1x128xf32> to vector<128x128xf32>
    %13 = arith.mulf %11, %12 : vector<128x128xf32>
    %14 = arith.addf %8, %13 : vector<128x128xf32>
    %c0_8 = arith.constant 0 : index
    %c2 = arith.constant 2 : index
    %15 = vector.load %arg2[%c0_8, %c2] : memref<128x4xf32, #tpu.memory_space<vmem>>, vector<128x1xf32>
    %c2_9 = arith.constant 2 : index
    %c0_10 = arith.constant 0 : index
    %16 = vector.load %arg1[%c2_9, %c0_10] : memref<4x128xf32, #tpu.memory_space<vmem>>, vector<1x128xf32>
    %17 = vector.broadcast %15 : vector<128x1xf32> to vector<128x128xf32>
    %18 = vector.broadcast %16 : vector<1x128xf32> to vector<128x128xf32>
    %19 = arith.mulf %17, %18 : vector<128x128xf32>
    %20 = arith.addf %14, %19 : vector<128x128xf32>
    %c0_11 = arith.constant 0 : index
    %c3 = arith.constant 3 : index
    %21 = vector.load %arg2[%c0_11, %c3] : memref<128x4xf32, #tpu.memory_space<vmem>>, vector<128x1xf32>
    %c3_12 = arith.constant 3 : index
    %c0_13 = arith.constant 0 : index
    %22 = vector.load %arg1[%c3_12, %c0_13] : memref<4x128xf32, #tpu.memory_space<vmem>>, vector<1x128xf32>
    %23 = vector.broadcast %21 : vector<128x1xf32> to vector<128x128xf32>
    %24 = vector.broadcast %22 : vector<1x128xf32> to vector<128x128xf32>
    %25 = arith.mulf %23, %24 : vector<128x128xf32>
    %26 = arith.addf %20, %25 : vector<128x128xf32>
    %cst = arith.constant 0.000000e+00 : f32
    %27 = vector.broadcast %cst : f32 to vector<128x128xf32>
    %28 = arith.maximumf %26, %27 : vector<128x128xf32>
    %c0_14 = arith.constant 0 : index
    %c0_15 = arith.constant 0 : index
    %29 = vector.load %arg4[%c0_14, %c0_15] : memref<8x128xf32, #tpu.memory_space<vmem>>, vector<8x128xf32>
    %cst_16 = arith.constant dense<0.000000e+00> : vector<8x128xf32>
    %30 = tpu.matmul %29, %28, %cst_16 {dimension_numbers = #tpu.dot_dimension_numbers<[1], [0], [0], [1], [0, 0, 1, 1], [], []>, precision = #tpu.contract_precision<fp32>} : vector<8x128xf32>, vector<128x128xf32>, vector<8x128xf32> -> vector<8x128xf32>
    %c0_17 = arith.constant 0 : index
    %c0_18 = arith.constant 0 : index
    %31 = vector.load %arg5[%c0_17, %c0_18] : memref<8x1xf32, #tpu.memory_space<vmem>>, vector<8x1xf32>
    %32 = vector.broadcast %31 : vector<8x1xf32> to vector<8x128xf32>
    %33 = arith.addf %30, %32 : vector<8x128xf32>
    %c0_19 = arith.constant 0 : index
    %c0_20 = arith.constant 0 : index
    %34 = vector.load %arg6[%c0_19, %c0_20] : memref<8x128xf32, #tpu.memory_space<vmem>>, vector<8x128xf32>
    tpu.vector_store %arg6[%c0_19, %c0_20], %33 {strides = array<i32>} : memref<8x128xf32, #tpu.memory_space<vmem>>, vector<8x128xf32>,
    return
  }
  func.func @transform_0(%arg0: i32) -> (i32, i32) {
    %c0_i32 = arith.constant 0 : i32
    %c0_i32_0 = arith.constant 0 : i32
    return %c0_i32, %arg0 : i32, i32
  }
  func.func @transform_1(%arg0: i32) -> (i32, i32) {
    %c0_i32 = arith.constant 0 : i32
    %c0_i32_0 = arith.constant 0 : i32
    %c0_i32_1 = arith.constant 0 : i32
    return %c0_i32, %c0_i32_0 : i32, i32
  }
  func.func @transform_2(%arg0: i32) -> (i32, i32) {
    %c0_i32 = arith.constant 0 : i32
    %c0_i32_0 = arith.constant 0 : i32
    %c0_i32_1 = arith.constant 0 : i32
    return %c0_i32, %c0_i32_0 : i32, i32
  }
  func.func @transform_3(%arg0: i32) -> (i32, i32) {
    %c0_i32 = arith.constant 0 : i32
    %c0_i32_0 = arith.constant 0 : i32
    %c0_i32_1 = arith.constant 0 : i32
    return %c0_i32, %c0_i32_0 : i32, i32
  }
  func.func @transform_4(%arg0: i32) -> (i32, i32) {
    %c0_i32 = arith.constant 0 : i32
    %c0_i32_0 = arith.constant 0 : i32
    %c0_i32_1 = arith.constant 0 : i32
    return %c0_i32, %c0_i32_0 : i32, i32
  }
  func.func @transform_5(%arg0: i32) -> (i32, i32) {
    %c0_i32 = arith.constant 0 : i32
    %c0_i32_0 = arith.constant 0 : i32
    return %c0_i32, %arg0 : i32, i32
  }
}

</mosaic_0001>

<bundles_post_ra>
// kernel: tpu_custom_call.1
= control target key start
LH: loop header
LB: loop body
LE: loop exit
PB: predicated region body
PF: predicated region fallthrough
CT: control target
= control target key end

     0   :  { %v1632_v2 = vmov 3   ;;  %v1633_v3 = vmov 0   ;;  %v1634_v5 = vmov 1   ;;  %s2417_s0 = inlined_call_operand.vmem [shape: f32[4,128], index: 0, kind: input, shape index: {}]   ;;  %s2418_s1 = inlined_call_operand.vmem [shape: f32[128,4], index: 1, kind: input, shape index: {}]   ;;  %s2419_s2 = inlined_call_operand.vmem [shape: f32[128,1], index: 2, kind: input, shape index: {}]   ;;  %s2420_s3 = inlined_call_operand.vmem [shape: f32[8,128], index: 3, kind: input, shape index: {}]   ;;  %s2421_s4 = inlined_call_operand.vmem [shape: f32[8,1], index: 4, kind: input, shape index: {}]   ;;  %s2422_s5 = inlined_call_operand.hbm [shape: f32[8,128], index: 5, kind: output, shape index: {}]  }
   0x1   :  { %v132_v0 = vld [vmem:[%s2418_s1 + $0x78] sm:$0xff]  ;;  %v131_v1 = vld [vmem:[%s2418_s1 + $0x70] sm:$0xff]  ;;  %1562 = vset.pattern.permute.xlu0 %v1632_v2  ;;  %1555 = vset.pattern.permute.xlu1 %v1633_v3  ;;  %v1680_v4 = vld [vmem:[%s2418_s1 + $0x60] sm:$0xff] }
   0x2   :  { %514 = vperm.xlu0 %1562, %v132_v0   ;;  %206 = vperm.xlu1 %1555, %v131_v1   ;;  %v1687_v6 = vld [vmem:[%s2418_s1 + $0x48] sm:$0xff] }
   0x3   :  { %v130_v7 = vld [vmem:[%s2418_s1 + $0x68] sm:$0xff] }
   0x6   :  { %502 = vperm.xlu0 %1562, %v1680_v4   ;;  %1556 = vset.pattern.permute.xlu1 %v1634_v5 }
   0x7   :  { %312 = vperm.xlu1 %1556, %v132_v0  }
   0x8   :  { %10 = vsyncpa [#allocation3], 0  ;;  %v1697_v8 = vld [vmem:[%s2418_s1 + $0x30] sm:$0xff]  ;;  %v1635_v9 = vmov 2   ;;  %v34_v10 = vld [vmem:[%s2419_s2 + $0x68] sm:$0xff]  ;;  %v1636_v16 = vmov 0.0  }
   0x9   :  { %v1714_v11 = vld [vmem:[%s2418_s1 + $0x18] sm:$0xff]  ;;  %v33_v12 = vld [vmem:[%s2419_s2 + $0x60] sm:$0xff]  ;;  %v35_v15 = vld [vmem:[%s2419_s2 + $0x70] sm:$0xff]  ;;  %1338 = vmatprep.subr.mxu0 %v1636_v16  ;;  %1373 = vmatprep.subr.mxu1 %v1636_v16  ;;  %vm1637_vm0 = vmmov 0  }
   0xa   :  { %490 = vperm.xlu0 %1562, %v1687_v6   ;;  %v128_v13 = vld [vmem:[%s2418_s1 + $0x58] sm:$0xff]  ;;  %v127_v17 = vld [vmem:[%s2418_s1 + $0x50] sm:$0xff]  ;;  %v29_v19 = vld [vmem:[%s2419_s2 + $0x40] sm:$0xff]  ;;  %1370 = vmatprep.mubr.msk.f32.mxu0 %vm1637_vm0, %v1636_v16 }
   0xb   :  { %1557 = vset.pattern.permute.xlu1 %v1633_v3  ;;  %v36_v14 = vld [vmem:[%s2419_s2 + $0x78] sm:$0xff]  ;;  %v31_v20 = vld [vmem:[%s2419_s2 + $0x50] sm:$0xff]  ;;  %v26_v21 = vld [vmem:[%s2419_s2 + $0x28] sm:$0xff]  ;;  %1405 = vmatprep.mubr.msk.f32.mxu1 %vm1637_vm0, %v1636_v16 }
   0xc   :  { %201 = vperm.xlu1 %1557, %v130_v7   ;;  %v32_v18 = vld [vmem:[%s2419_s2 + $0x58] sm:$0xff]  ;;  %v23_v22 = vld [vmem:[%s2419_s2 + $0x10] sm:$0xff]  ;;  %v1766_v23 = vld [vmem:[%s2418_s1] sm:$0xff] }
   0xd   :  { %v30_v24 = vld [vmem:[%s2419_s2 + $0x48] sm:$0xff]  ;;  %v125_v25 = vld [vmem:[%s2418_s1 + $0x40] sm:$0xff]  ;;  %v124_v26 = vld [vmem:[%s2418_s1 + $0x38] sm:$0xff] }
   0xe   :  { %478 = vperm.xlu0 %1562, %v1697_v8   ;;  %v1789_v27 = vld [vmem:[%s2418_s1 + $0x8] sm:$0xff]  ;;  %v28_v28 = vld [vmem:[%s2419_s2 + $0x38] sm:$0xff]  ;;  %v27_v33 = vld [vmem:[%s2419_s2 + $0x30] sm:$0xff] }
   0xf   :  { %v1818_v36 = vld [vmem:[%s2418_s1 + $0x28] sm:$0xff]  ;;  %v1834_v44 = vld [vmem:[%s2418_s1 + $0x20] sm:$0xff] }
  0x10   :  { %1558 = vset.pattern.permute.xlu1 %v1635_v9  ;;  %v1849_v49 = vld [vmem:[%s2417_s0] ss:$0 sm:$0xff]  ;;  %v1858_v53 = vld [vmem:[%s2417_s0 + $0x1] ss:$0 sm:$0xff]  ;;  %v1866_v55 = vld [vmem:[%s2417_s0 + $0x3] ss:$0 sm:$0xff] }
  0x11   :  { %413 = vperm.xlu1 %1558, %v132_v0   ;;  %v25_v54 = vld [vmem:[%s2419_s2 + $0x20] sm:$0xff] }
  0x12   :  { %1590 = vset.pattern.permute.xlu0 %v1634_v5  ;;  %v1871_v56 = vld [vmem:[%s2417_s0 + $0x2] ss:$0 sm:$0xff] }
  0x13   :  { %308 = vperm.xlu0 %1590, %v131_v1  }
  0x15   :  { %1559 = vset.pattern.permute.xlu1 %v1633_v3 }
  0x16   :  { %104 = vperm.xlu1 %1559, %v34_v10  }
  0x17   :  { %300 = vperm.xlu0 %1590, %v1680_v4  }
  0x1a   :  { %1560 = vset.pattern.permute.xlu1 %v1634_v5 }
  0x1b   :  { %288 = vperm.xlu0 %1590, %v1687_v6   ;;  %304 = vperm.xlu1 %1560, %v130_v7  }
  0x1f   :  { %276 = vperm.xlu0 %1590, %v1697_v8   ;;  %1561 = vset.pattern.permute.xlu1 %v1635_v9 }
  0x20   :  { %409 = vperm.xlu1 %1561, %v131_v1  }
  0x23   :  { %264 = vperm.xlu0 %1590, %v1714_v11  }
  0x24   :  { %1563 = vset.pattern.permute.xlu1 %v1633_v3 }
  0x25   :  { %99 = vperm.xlu1 %1563, %v33_v12  }
  0x27   :  { %1592 = vset.pattern.permute.xlu0 %v1633_v3 }
  0x28   :  { %211 = vperm.xlu0 %1592, %v132_v0  }
  0x29   :  { %191 = vperm.xlu1 %1563, %v128_v13  }
  0x2c   :  { %114 = vperm.xlu0 %1592, %v36_v14  }
  0x2d   :  { %1564 = vset.pattern.permute.xlu1 %v1635_v9 }
  0x2e   :  { %405 = vperm.xlu1 %1564, %v130_v7  }
  0x30   :  { %109 = vperm.xlu0 %1592, %v35_v15  }
  0x32   :  { %1565 = vset.pattern.permute.xlu1 %v1632_v2 }
  0x33   :  { %510 = vperm.xlu1 %1565, %v131_v1  }
  0x34   :  { %196 = vperm.xlu0 %1592, %v1680_v4  }
  0x37   :  { %1566 = vset.pattern.permute.xlu1 %v1633_v3 }
  0x38   :  { %186 = vperm.xlu1 %1566, %v127_v17   ;;  %94 = vperm.xlu0 %1592, %v32_v18  }
  0x3c   :  { %1567 = vset.pattern.permute.xlu1 %v1634_v5  ;;  %181 = vperm.xlu0 %1592, %v1687_v6  }
  0x3d   :  { %296 = vperm.xlu1 %1567, %v128_v13  }
  0x40   :  { %79 = vperm.xlu0 %1592, %v29_v19  }
  0x41   :  { %1568 = vset.pattern.permute.xlu1 %v1632_v2 }
  0x42   :  { %506 = vperm.xlu1 %1568, %v130_v7  }
  0x44   :  { %166 = vperm.xlu0 %1592, %v1697_v8  }
  0x46   :  { %1569 = vset.pattern.permute.xlu1 %v1633_v3 }
  0x47   :  { %89 = vperm.xlu1 %1569, %v31_v20  }
  0x48   :  { %64 = vperm.xlu0 %1592, %v26_v21  }
  0x4b   :  { %1570 = vset.pattern.permute.xlu1 %v1634_v5 }
  0x4c   :  { %292 = vperm.xlu1 %1570, %v127_v17   ;;  %151 = vperm.xlu0 %1592, %v1714_v11  }
  0x50   :  { %1571 = vset.pattern.permute.xlu1 %v1635_v9  ;;  %49 = vperm.xlu0 %1592, %v23_v22  }
  0x51   :  { %397 = vperm.xlu1 %1571, %v128_v13  }
  0x54   :  { %136 = vperm.xlu0 %1592, %v1766_v23  }
  0x55   :  { %1572 = vset.pattern.permute.xlu1 %v1633_v3 }
  0x56   :  { %84 = vperm.xlu1 %1572, %v30_v24  }
  0x58   :  { %1599 = vset.pattern.permute.xlu0 %v1635_v9 }
  0x59   :  { %401 = vperm.xlu0 %1599, %v1680_v4  }
  0x5a   :  { %176 = vperm.xlu1 %1572, %v125_v25  }
  0x5d   :  { %389 = vperm.xlu0 %1599, %v1687_v6  }
  0x5e   :  { %1573 = vset.pattern.permute.xlu1 %v1635_v9 }
  0x5f   :  { %393 = vperm.xlu1 %1573, %v127_v17  }
  0x61   :  { %377 = vperm.xlu0 %1599, %v1697_v8  }
  0x63   :  { %1574 = vset.pattern.permute.xlu1 %v1632_v2 }
  0x64   :  { %498 = vperm.xlu1 %1574, %v128_v13  }
  0x65   :  { %365 = vperm.xlu0 %1599, %v1714_v11  }
  0x68   :  { %1575 = vset.pattern.permute.xlu1 %v1633_v3 }
  0x69   :  { %171 = vperm.xlu1 %1575, %v124_v26   ;;  %357 = vperm.xlu0 %1599, %v1789_v27  }
  0x6d   :  { %1576 = vset.pattern.permute.xlu1 %v1634_v5  ;;  %1604 = vset.pattern.permute.xlu0 %v1632_v2 }
  0x6e   :  { %284 = vperm.xlu1 %1576, %v125_v25   ;;  %466 = vperm.xlu0 %1604, %v1714_v11  }
  0x72   :  { %1577 = vset.pattern.permute.xlu1 %v1632_v2  ;;  %458 = vperm.xlu0 %1604, %v1789_v27  }
  0x73   :  { %494 = vperm.xlu1 %1577, %v127_v17  }
  0x76   :  { %1609 = vset.pattern.permute.xlu0 %v1633_v3 }
  0x77   :  { %1578 = vset.pattern.permute.xlu1 %v1633_v3 }
  0x78   :  { %74 = vperm.xlu1 %1578, %v28_v28  }
  0x7c   :  { %1579 = vset.pattern.permute.xlu1 %v1634_v5 }
  0x7d   :  { %v207_v29 = vpop.permute.xlu1 %206  ;;  %280 = vperm.xlu1 %1579, %v124_v26   ;;  %v515_v30 = vpop.permute.xlu0 %514 }
  0x7e   :  { %v232_v60 = vmul.f32 %v1849_v49, %v207_v29  ;;  %v536_v62 = vmul.f32 %v1866_v55, %v515_v30 }
  0x81   :  { %1580 = vset.pattern.permute.xlu1 %v1635_v9  ;;  %v1805_v31 = vpop.permute.xlu0 %502 }
  0x82   :  { %v313_v32 = vpop.permute.xlu1 %312  ;;  %385 = vperm.xlu1 %1580, %v125_v25  }
  0x83   :  { %v334_v58 = vmul.f32 %v1858_v53, %v313_v32 }
  0x85   :  { %v1810_v34 = vpop.permute.xlu0 %490 }
  0x86   :  { %1581 = vset.pattern.permute.xlu1 %v1633_v3 }
  0x87   :  { %v1813_v35 = vpop.permute.xlu1 %201  ;;  %69 = vperm.xlu1 %1581, %v27_v33  }
  0x88   :  { %v231_v29 = vmul.f32 %v1849_v49, %v1813_v35  ;;  %v1920_v35 = vld [vmem:[%s2418_s1 + $0x10] sm:$0xff] }
  0x89   :  { %v1820_v37 = vpop.permute.xlu0 %478 }
  0x8b   :  { %161 = vperm.xlu1 %1581, %v1818_v36  }
  0x8c   :  { %v414_v38 = vpop.permute.xlu1 %413 }
  0x8d   :  { %v435_v63 = vmul.f32 %v1871_v56, %v414_v38 }
  0x8e   :  { %v309_v39 = vpop.permute.xlu0 %308 }
  0x8f   :  { %1582 = vset.pattern.permute.xlu1 %v1635_v9  ;;  %v333_v0 = vmul.f32 %v1858_v53, %v309_v39 }
  0x90   :  { %381 = vperm.xlu1 %1582, %v124_v26  }
  0x91   :  { %v1824_v40 = vpop.permute.xlu1 %104 }
  0x92   :  { %v1826_v41 = vpop.permute.xlu0 %300 }
  0x94   :  { %1583 = vset.pattern.permute.xlu1 %v1632_v2 }
  0x95   :  { %486 = vperm.xlu1 %1583, %v125_v25   ;;  %v24_v25 = vld [vmem:[%s2419_s2 + $0x18] sm:$0xff] }
  0x96   :  { %v305_v42 = vpop.permute.xlu1 %304  ;;  %v1829_v43 = vpop.permute.xlu0 %288 }
  0x97   :  { %v332_v32 = vmul.f32 %v1858_v53, %v305_v42  ;;  %v247_v42 = vadd.f32 %v231_v29, %v1824_v40 }
  0x99   :  { %1584 = vset.pattern.permute.xlu1 %v1633_v3 }
  0x9a   :  { %156 = vperm.xlu1 %1584, %v1834_v44   ;;  %v1838_v45 = vpop.permute.xlu0 %276 }
  0x9b   :  { %v410_v46 = vpop.permute.xlu1 %409 }
  0x9c   :  { %v434_v8 = vmul.f32 %v1871_v56, %v410_v46 }
  0x9e   :  { %1585 = vset.pattern.permute.xlu1 %v1634_v5  ;;  %v1841_v47 = vpop.permute.xlu0 %264 }
  0x9f   :  { %272 = vperm.xlu1 %1585, %v1818_v36  }
  0xa0   :  { %v1844_v48 = vpop.permute.xlu1 %99 }
  0xa3   :  { %v212_v50 = vpop.permute.xlu0 %211  ;;  %1586 = vset.pattern.permute.xlu1 %v1632_v2 }
  0xa4   :  { %v233_v51 = vmul.f32 %v1849_v49, %v212_v50  ;;  %v1853_v52 = vpop.permute.xlu1 %191  ;;  %482 = vperm.xlu1 %1586, %v124_v26  }
  0xa7   :  { %v115_v57 = vpop.permute.xlu0 %114 }
  0xa8   :  { %v249_v59 = vadd.f32 %v233_v51, %v115_v57  ;;  %1587 = vset.pattern.permute.xlu1 %v1633_v3  ;;  %v348_v57 = vadd.f32 %v332_v32, %v247_v42  ;;  %v328_v42 = vmul.f32 %v1858_v53, %v1829_v43 }
  0xa9   :  { %v406_v61 = vpop.permute.xlu1 %405  ;;  %59 = vperm.xlu1 %1587, %v25_v54  }
  0xaa   :  { %v350_v1 = vadd.f32 %v334_v58, %v249_v59  ;;  %v433_v46 = vmul.f32 %v1871_v56, %v406_v61 }
  0xab   :  { %v110_v4 = vpop.permute.xlu0 %109 }
  0xac   :  { %v451_v6 = vadd.f32 %v435_v63, %v350_v1  ;;  %v248_v7 = vadd.f32 %v232_v60, %v110_v4  ;;  %v449_v60 = vadd.f32 %v433_v46, %v348_v57 }
  0xad   :  { %1588 = vset.pattern.permute.xlu1 %v1634_v5 }
  0xae   :  { %v552_v10 = vadd.f32 %v536_v62, %v451_v6  ;;  %v349_v11 = vadd.f32 %v333_v0, %v248_v7  ;;  %v511_v12 = vpop.permute.xlu1 %510  ;;  %268 = vperm.xlu1 %1588, %v1834_v44  }
  0xaf   :  { %v535_v13 = vmul.f32 %v1866_v55, %v511_v12  ;;  %v1883_v14 = vpop.permute.xlu0 %196 }
  0xb0   :  { %v568_v15 = vmax.f32 %v552_v10, 0.0  ;;  %v450_v17 = vadd.f32 %v434_v8, %v349_v11 }
  0xb2   :  { %v551_v18 = vadd.f32 %v535_v13, %v450_v17  ;;  %1589 = vset.pattern.permute.xlu1 %v1635_v9  ;;  %v1886_v19 = vand.u32 4294901760, %v568_v15  ;;  %v230_v17 = vmul.f32 %v1849_v49, %v1883_v14  ;;  %v533_v14 = vmul.f32 %v1866_v55, %v1805_v31 }
  0xb3   :  { %v1888_v20 = vpop.permute.xlu1 %186  ;;  %v1890_v21 = vpop.permute.xlu0 %94  ;;  %373 = vperm.xlu1 %1589, %v1818_v36  }
  0xb4   :  { %v567_v22 = vmax.f32 %v551_v18, 0.0  ;;  %1339 = vmatpush3.msra.mxu0 %v1886_v19  ;;  %v1895_v24 = vsub.f32 %v568_v15, %v1886_v19 }
  0xb5   :  { %1340 = vmatprep.subr.mxu0 %v1636_v16 }
  0xb6   :  { %v1901_v26 = vand.u32 4294901760, %v567_v22  ;;  %v670_v28 = vand.u32 4294901760, %v1895_v24 }
  0xb7   :  { %1591 = vset.pattern.permute.xlu1 %v1633_v3  ;;  %v182_v30 = vpop.permute.xlu0 %181 }
  0xb8   :  { %v1909_v33 = vsub.f32 %v567_v22, %v1901_v26  ;;  %1341 = vmatpush3.msra.mxu0 %v1901_v26  ;;  %v1912_v38 = vpop.permute.xlu1 %296  ;;  %54 = vperm.xlu1 %1591, %v24_v25   ;;  %v671_v39 = vsub.f32 %v1895_v24, %v670_v28  ;;  %v331_v22 = vmul.f32 %v1858_v53, %v1826_v41 }
  0xb9   :  { %1342 = vmatprep.subr.mxu0 %v1636_v16  ;;  %v246_v25 = vadd.f32 %v230_v17, %v1844_v48  ;;  %v227_v29 = vmul.f32 %v1849_v49, %v182_v30  ;;  %v22_v48 = vld [vmem:[%s2419_s2 + $0x8] sm:$0xff]  ;;  %v530_v30 = vmul.f32 %v1866_v55, %v1810_v34 }
  0xba   :  { %v672_v50 = vand.u32 4294901760, %v671_v39  ;;  %v677_v51 = vand.u32 4294901760, %v1909_v33 }
  0xbb   :  { %v1926_v54 = vpop.permute.xlu0 %79 }
  0xbc   :  { %1374 = vmatpush3.msra.mxu1 %v672_v50  ;;  %146 = vperm.xlu1 %1591, %v1920_v35   ;;  %v678_v58 = vsub.f32 %v1909_v33, %v677_v51  ;;  %v347_v50 = vadd.f32 %v331_v22, %v246_v25 }
  0xbd   :  { %v507_v59 = vpop.permute.xlu1 %506  ;;  %1375 = vmatprep.subr.mxu1 %v1636_v16 }
  0xbe   :  { %v534_v40 = vmul.f32 %v1866_v55, %v507_v59  ;;  %v679_v61 = vand.u32 4294901760, %v678_v58 }
  0xbf   :  { %v1934_v62 = vpop.permute.xlu0 %166 }
  0xc0   :  { %v550_v63 = vadd.f32 %v534_v40, %v449_v60  ;;  %1376 = vmatpush3.msra.mxu1 %v679_v61  ;;  %1593 = vset.pattern.permute.xlu1 %v1635_v9  ;;  %v229_v40 = vmul.f32 %v1849_v49, %v1853_v52 }
  0xc1   :  { %369 = vperm.xlu1 %1593, %v1834_v44   ;;  %1377 = vmatprep.subr.mxu1 %v1636_v16 }
  0xc2   :  { %v566_v0 = vmax.f32 %v550_v63, 0.0  ;;  %v1939_v1 = vpop.permute.xlu1 %89 }
  0xc3   :  { %v1941_v4 = vpop.permute.xlu0 %64 }
  0xc4   :  { %v1943_v6 = vand.u32 4294901760, %v566_v0 }
  0xc5   :  { %1594 = vset.pattern.permute.xlu1 %v1632_v2 }
  0xc6   :  { %v1947_v7 = vsub.f32 %v566_v0, %v1943_v6  ;;  %1343 = vmatpush3.msra.mxu0 %v1943_v6  ;;  %474 = vperm.xlu1 %1594, %v1818_v36  }
  0xc7   :  { %v1951_v8 = vpop.permute.xlu1 %292  ;;  %v1953_v10 = vpop.permute.xlu0 %151  ;;  %1344 = vmatprep.subr.mxu0 %v1636_v16 }
  0xc8   :  { %v684_v11 = vand.u32 4294901760, %v1947_v7 }
  0xca   :  { %1595 = vset.pattern.permute.xlu1 %v1633_v3  ;;  %v685_v12 = vsub.f32 %v1947_v7, %v684_v11 }
  0xcb   :  { %141 = vperm.xlu1 %1595, %v1789_v27   ;;  %v1962_v13 = vpop.permute.xlu0 %49 }
  0xcc   :  { %v398_v15 = vpop.permute.xlu1 %397  ;;  %v686_v36 = vand.u32 4294901760, %v685_v12  ;;  %v245_v12 = vadd.f32 %v229_v40, %v1890_v21 }
  0xcd   :  { %v431_v34 = vmul.f32 %v1871_v56, %v398_v15 }
  0xce   :  { %1378 = vmatpush3.msra.mxu1 %v686_v36 }
  0xcf   :  { %1596 = vset.pattern.permute.xlu1 %v1634_v5  ;;  %v1967_v18 = vpop.permute.xlu0 %136  ;;  %1379 = vmatprep.subr.mxu1 %v1636_v16 }
  0xd0   :  { %260 = vperm.xlu1 %1596, %v1920_v35  }
  0xd1   :  { %v85_v32 = vpop.permute.xlu1 %84 }
  0xd2   :  { %v243_v46 = vadd.f32 %v227_v29, %v85_v32 }
  0xd4   :  { %1597 = vset.pattern.permute.xlu1 %v1632_v2  ;;  %v402_v39 = vpop.permute.xlu0 %401  ;;  %v344_v59 = vadd.f32 %v328_v42, %v243_v46  ;;  %v21_v46 = vld [vmem:[%s2419_s2] sm:$0xff] }
  0xd5   :  { %v432_v57 = vmul.f32 %v1871_v56, %v402_v39  ;;  %v1981_v58 = vpop.permute.xlu1 %176  ;;  %470 = vperm.xlu1 %1597, %v1834_v44   ;;  %v330_v44 = vmul.f32 %v1858_v53, %v1912_v38 }
  0xd7   :  { %v448_v41 = vadd.f32 %v432_v57, %v347_v50  ;;  %v346_v22 = vadd.f32 %v330_v44, %v245_v12  ;;  %v228_v57 = vmul.f32 %v1849_v49, %v1888_v20 }
  0xd8   :  { %v390_v31 = vpop.permute.xlu0 %389 }
  0xd9   :  { %v549_v60 = vadd.f32 %v533_v14, %v448_v41  ;;  %v429_v43 = vmul.f32 %v1871_v56, %v390_v31  ;;  %1598 = vset.pattern.permute.xlu1 %v1633_v3  ;;  %v447_v38 = vadd.f32 %v431_v34, %v346_v22  ;;  %v329_v41 = vmul.f32 %v1858_v53, %v1951_v8 }
  0xda   :  { %v394_v61 = vpop.permute.xlu1 %393  ;;  %44 = vperm.xlu1 %1598, %v22_v48  }
  0xdb   :  { %v565_v63 = vmax.f32 %v549_v60, 0.0  ;;  %v445_v0 = vadd.f32 %v429_v43, %v344_v59  ;;  %v430_v60 = vmul.f32 %v1871_v56, %v394_v61 }
  0xdd   :  { %v1997_v36 = vand.u32 4294901760, %v565_v63  ;;  %v546_v17 = vadd.f32 %v530_v30, %v445_v0  ;;  %v244_v30 = vadd.f32 %v228_v57, %v1939_v1 }
  0xde   :  { %1600 = vset.pattern.permute.xlu1 %v1634_v5 }
  0xdf   :  { %v2001_v25 = vsub.f32 %v565_v63, %v1997_v36  ;;  %v499_v52 = vpop.permute.xlu1 %498  ;;  %1345 = vmatpush3.msra.mxu0 %v1997_v36  ;;  %256 = vperm.xlu1 %1600, %v1789_v27   ;;  %v562_v59 = vmax.f32 %v546_v17, 0.0  ;;  %v345_v43 = vadd.f32 %v329_v41, %v244_v30  ;;  %v226_v30 = vmul.f32 %v1849_v49, %v1981_v58 }
  0xe0   :  { %v532_v29 = vmul.f32 %v1866_v55, %v499_v52  ;;  %1346 = vmatprep.subr.mxu0 %v1636_v16 }
  0xe1   :  { %v691_v21 = vand.u32 4294901760, %v2001_v25  ;;  %v2041_v44 = vand.u32 4294901760, %v562_v59  ;;  %v446_v63 = vadd.f32 %v430_v60, %v345_v43  ;;  %v242_v43 = vadd.f32 %v226_v30, %v1926_v54 }
  0xe2   :  { %v548_v15 = vadd.f32 %v532_v29, %v447_v38 }
  0xe3   :  { %1601 = vset.pattern.permute.xlu1 %v1635_v9  ;;  %v692_v32 = vsub.f32 %v2001_v25, %v691_v21  ;;  %v2047_v61 = vsub.f32 %v562_v59, %v2041_v44 }
  0xe4   :  { %v564_v14 = vmax.f32 %v548_v15, 0.0  ;;  %v2012_v39 = vpop.permute.xlu1 %171  ;;  %361 = vperm.xlu1 %1601, %v1920_v35  }
  0xe5   :  { %v693_v27 = vand.u32 4294901760, %v692_v32  ;;  %v712_v22 = vand.u32 4294901760, %v2047_v61  ;;  %v224_v32 = vmul.f32 %v1849_v49, %v1934_v62  ;;  %v527_v62 = vmul.f32 %v1866_v55, %v1820_v37 }
  0xe6   :  { %v2015_v42 = vand.u32 4294901760, %v564_v14  ;;  %v225_v54 = vmul.f32 %v1849_v49, %v2012_v39 }
  0xe7   :  { %1380 = vmatpush3.msra.mxu1 %v693_v27  ;;  %v378_v27 = vpop.permute.xlu0 %377 }
  0xe8   :  { %v2021_v50 = vsub.f32 %v564_v14, %v2015_v42  ;;  %1347 = vmatpush3.msra.mxu0 %v2015_v42  ;;  %1602 = vset.pattern.permute.xlu1 %v1633_v3 }
  0xe9   :  { %v2029_v48 = vpop.permute.xlu1 %284  ;;  %39 = vperm.xlu1 %1602, %v21_v46   ;;  %1381 = vmatprep.subr.mxu1 %v1636_v16  ;;  %v325_v46 = vmul.f32 %v1858_v53, %v1838_v45 }
  0xea   :  { %v698_v31 = vand.u32 4294901760, %v2021_v50  ;;  %1348 = vmatprep.subr.mxu0 %v1636_v16  ;;  %v327_v60 = vmul.f32 %v1858_v53, %v2029_v48 }
  0xec   :  { %v699_v20 = vsub.f32 %v2021_v50, %v698_v31 }
  0xed   :  { %1603 = vset.pattern.permute.xlu1 %v1634_v5 }
  0xee   :  { %v495_v8 = vpop.permute.xlu1 %494  ;;  %252 = vperm.xlu1 %1603, %v1766_v23   ;;  %v700_v40 = vand.u32 4294901760, %v699_v20 }
  0xef   :  { %v531_v0 = vmul.f32 %v1866_v55, %v495_v8 }
  0xf0   :  { %1382 = vmatpush3.msra.mxu1 %v700_v40  ;;  %v343_v40 = vadd.f32 %v327_v60, %v242_v43 }
  0xf1   :  { %v547_v1 = vadd.f32 %v531_v0, %v446_v63  ;;  %1383 = vmatprep.subr.mxu1 %v1636_v16 }
  0xf2   :  { %1605 = vset.pattern.permute.xlu1 %v1632_v2 }
  0xf3   :  { %v563_v12 = vmax.f32 %v547_v1, 0.0  ;;  %v75_v5 = vpop.permute.xlu1 %74  ;;  %462 = vperm.xlu1 %1605, %v1920_v35  }
  0xf5   :  { %v2050_v34 = vand.u32 4294901760, %v563_v12 }
  0xf7   :  { %v2053_v17 = vsub.f32 %v563_v12, %v2050_v34  ;;  %1349 = vmatpush3.msra.mxu0 %v2050_v34  ;;  %1606 = vset.pattern.permute.xlu1 %v1635_v9  ;;  %v713_v9 = vsub.f32 %v2047_v61, %v712_v22 }
  0xf8   :  { %v281_v52 = vpop.permute.xlu1 %280  ;;  %1350 = vmatprep.subr.mxu0 %v1636_v16  ;;  %353 = vperm.xlu1 %1606, %v1766_v23  }
  0xf9   :  { %1351 = vmatpush3.msra.mxu0 %v2041_v44  ;;  %v705_v35 = vand.u32 4294901760, %v2053_v17  ;;  %v714_v14 = vand.u32 4294901760, %v713_v9  ;;  %v326_v48 = vmul.f32 %v1858_v53, %v281_v52 }
  0xfa   :  { %1352 = vmatprep.subr.mxu0 %v1636_v16 }
  0xfb   :  { %v706_v38 = vsub.f32 %v2053_v17, %v705_v35 }
  0xfc   :  { %1607 = vset.pattern.permute.xlu1 %v1632_v2 }
  0xfd   :  { %v386_v29 = vpop.permute.xlu1 %385  ;;  %454 = vperm.xlu1 %1607, %v1766_v23   ;;  %v707_v15 = vand.u32 4294901760, %v706_v38  ;;  %v426_v23 = vmul.f32 %v1871_v56, %v378_v27 }
  0xfe   :  { %v428_v8 = vmul.f32 %v1871_v56, %v386_v29 }
  0xff   :  { %1384 = vmatpush3.msra.mxu1 %v707_v15 }
 0x100   :  { %1385 = vmatprep.subr.mxu1 %v1636_v16  ;;  %v444_v0 = vadd.f32 %v428_v8, %v343_v40 }
 0x101   :  { %1386 = vmatpush3.msra.mxu1 %v714_v14  ;;  %1608 = vset.pattern.permute.xlu1 %v1633_v3 }
 0x102   :  { %v70_v57 = vpop.permute.xlu1 %69  ;;  %1387 = vmatprep.subr.mxu1 %v1636_v16 }
 0x103   :  { %v240_v2 = vadd.f32 %v224_v32, %v70_v57  ;;  %v241_v32 = vadd.f32 %v225_v54, %v75_v5 }
 0x105   :  { %v341_v45 = vadd.f32 %v325_v46, %v240_v2  ;;  %v342_v57 = vadd.f32 %v326_v48, %v241_v32  ;;  %v322_v48 = vmul.f32 %v1858_v53, %v1841_v47 }
 0x106   :  { %v2085_v41 = vpop.permute.xlu1 %161 }
 0x107   :  { %v442_v3 = vadd.f32 %v426_v23, %v341_v45 }
 0x109   :  { %v543_v59 = vadd.f32 %v527_v62, %v442_v3 }
 0x10b   :  { %v382_v20 = vpop.permute.xlu1 %381  ;;  %v559_v14 = vmax.f32 %v543_v59, 0.0 }
 0x10c   :  { %v427_v27 = vmul.f32 %v1871_v56, %v382_v20 }
 0x10d   :  { %v2111_v62 = vand.u32 4294901760, %v559_v14 }
 0x10e   :  { %v443_v39 = vadd.f32 %v427_v27, %v342_v57  ;;  %v223_v57 = vmul.f32 %v1849_v49, %v2085_v41 }
 0x10f   :  { %v2116_v5 = vsub.f32 %v559_v14, %v2111_v62  ;;  %v366_v14 = vpop.permute.xlu0 %365 }
 0x110   :  { %v487_v63 = vpop.permute.xlu1 %486 }
 0x111   :  { %v529_v37 = vmul.f32 %v1866_v55, %v487_v63  ;;  %v733_v20 = vand.u32 4294901760, %v2116_v5 }
 0x113   :  { %v545_v1 = vadd.f32 %v529_v37, %v444_v0  ;;  %v734_v63 = vsub.f32 %v2116_v5, %v733_v20 }
 0x115   :  { %v561_v12 = vmax.f32 %v545_v1, 0.0  ;;  %v2094_v38 = vpop.permute.xlu1 %156  ;;  %v735_v1 = vand.u32 4294901760, %v734_v63 }
 0x117   :  { %v2096_v9 = vand.u32 4294901760, %v561_v12 }
 0x119   :  { %v2099_v58 = vsub.f32 %v561_v12, %v2096_v9  ;;  %1353 = vmatpush3.msra.mxu0 %v2096_v9  ;;  %v221_v12 = vmul.f32 %v1849_v49, %v1953_v10  ;;  %v239_v10 = vadd.f32 %v223_v57, %v1941_v4 }
 0x11a   :  { %v273_v29 = vpop.permute.xlu1 %272  ;;  %1354 = vmatprep.subr.mxu0 %v1636_v16 }
 0x11b   :  { %v719_v15 = vand.u32 4294901760, %v2099_v58 }
 0x11d   :  { %v720_v46 = vsub.f32 %v2099_v58, %v719_v15 }
 0x11f   :  { %v483_v2 = vpop.permute.xlu1 %482  ;;  %v721_v23 = vand.u32 4294901760, %v720_v46 }
 0x120   :  { %v528_v52 = vmul.f32 %v1866_v55, %v483_v2  ;;  %v324_v2 = vmul.f32 %v1858_v53, %v273_v29 }
 0x121   :  { %1388 = vmatpush3.msra.mxu1 %v721_v23  ;;  %v358_v23 = vpop.permute.xlu0 %357 }
 0x122   :  { %v544_v45 = vadd.f32 %v528_v52, %v443_v39  ;;  %1389 = vmatprep.subr.mxu1 %v1636_v16 }
 0x124   :  { %v560_v3 = vmax.f32 %v544_v45, 0.0  ;;  %v60_v30 = vpop.permute.xlu1 %59  ;;  %v340_v45 = vadd.f32 %v324_v2, %v239_v10 }
 0x125   :  { %v467_v63 = vpop.permute.xlu0 %466 }
 0x126   :  { %v2118_v59 = vand.u32 4294901760, %v560_v3  ;;  %v524_v41 = vmul.f32 %v1866_v55, %v467_v63 }
 0x128   :  { %v2121_v60 = vsub.f32 %v560_v3, %v2118_v59  ;;  %1355 = vmatpush3.msra.mxu0 %v2118_v59  ;;  %v423_v3 = vmul.f32 %v1871_v56, %v366_v14 }
 0x129   :  { %v269_v43 = vpop.permute.xlu1 %268  ;;  %1356 = vmatprep.subr.mxu0 %v1636_v16 }
 0x12a   :  { %1357 = vmatpush3.msra.mxu0 %v2111_v62  ;;  %v726_v8 = vand.u32 4294901760, %v2121_v60  ;;  %v323_v14 = vmul.f32 %v1858_v53, %v269_v43 }
 0x12b   :  { %1358 = vmatprep.subr.mxu0 %v1636_v16 }
 0x12c   :  { %v727_v40 = vsub.f32 %v2121_v60, %v726_v8 }
 0x12e   :  { %v374_v0 = vpop.permute.xlu1 %373  ;;  %v728_v37 = vand.u32 4294901760, %v727_v40 }
 0x12f   :  { %v425_v52 = vmul.f32 %v1871_v56, %v374_v0  ;;  %v222_v0 = vmul.f32 %v1849_v49, %v2094_v38 }
 0x130   :  { %1390 = vmatpush3.msra.mxu1 %v728_v37 }
 0x131   :  { %1391 = vmatprep.subr.mxu1 %v1636_v16  ;;  %v441_v40 = vadd.f32 %v425_v52, %v340_v45  ;;  %v238_v2 = vadd.f32 %v222_v0, %v60_v30  ;;  %v570_v45 = vld [vmem:[%s2421_s4] sm:$0xff] }
 0x132   :  { %1392 = vmatpush3.msra.mxu1 %v735_v1  ;;  %573 = vperm.xlu1 %1608, %v570_v45  }
 0x133   :  { %v55_v54 = vpop.permute.xlu1 %54  ;;  %1393 = vmatprep.subr.mxu1 %v1636_v16  ;;  %v339_v38 = vadd.f32 %v323_v14, %v238_v2 }
 0x134   :  { %v237_v32 = vadd.f32 %v221_v12, %v55_v54 }
 0x136   :  { %v338_v27 = vadd.f32 %v322_v48, %v237_v32 }
 0x137   :  { %v2141_v46 = vpop.permute.xlu1 %146 }
 0x138   :  { %v439_v12 = vadd.f32 %v423_v3, %v338_v27 }
 0x13a   :  { %v540_v32 = vadd.f32 %v524_v41, %v439_v12 }
 0x13c   :  { %v370_v39 = vpop.permute.xlu1 %369  ;;  %v556_v10 = vmax.f32 %v540_v32, 0.0 }
 0x13d   :  { %v424_v52 = vmul.f32 %v1871_v56, %v370_v39 }
 0x13f   :  { %v440_v63 = vadd.f32 %v424_v52, %v339_v38  ;;  %v421_v38 = vmul.f32 %v1871_v56, %v358_v23 }
 0x141   :  { %v475_v47 = vpop.permute.xlu1 %474 }
 0x142   :  { %v526_v37 = vmul.f32 %v1866_v55, %v475_v47 }
 0x144   :  { %v542_v1 = vadd.f32 %v526_v37, %v441_v40  ;;  %v2169_v40 = vand.u32 4294901760, %v556_v10 }
 0x146   :  { %v558_v54 = vmax.f32 %v542_v1, 0.0  ;;  %v142_v29 = vpop.permute.xlu1 %141  ;;  %v2174_v39 = vsub.f32 %v556_v10, %v2169_v40 }
 0x147   :  { %v219_v14 = vmul.f32 %v1849_v49, %v142_v29 }
 0x148   :  { %v2151_v48 = vand.u32 4294901760, %v558_v54  ;;  %v2423_v32 = vand.u32 4294901760, %v2174_v39 }
 0x14a   :  { %v2154_v4 = vsub.f32 %v558_v54, %v2151_v48  ;;  %1359 = vmatpush3.msra.mxu0 %v2151_v48 }
 0x14b   :  { %v261_v57 = vpop.permute.xlu1 %260  ;;  %1360 = vmatprep.subr.mxu0 %v1636_v16 }
 0x14c   :  { %v740_v27 = vand.u32 4294901760, %v2154_v4  ;;  %v321_v23 = vmul.f32 %v1858_v53, %v261_v57 }
 0x14e   :  { %v741_v3 = vsub.f32 %v2154_v4, %v740_v27 }
 0x150   :  { %v471_v43 = vpop.permute.xlu1 %470  ;;  %v742_v47 = vand.u32 4294901760, %v741_v3  ;;  %v755_v3 = vsub.f32 %v2174_v39, %v2423_v32 }
 0x151   :  { %v525_v30 = vmul.f32 %v1866_v55, %v471_v43 }
 0x152   :  { %1394 = vmatpush3.msra.mxu1 %v742_v47 }
 0x153   :  { %v541_v37 = vadd.f32 %v525_v30, %v440_v63  ;;  %1395 = vmatprep.subr.mxu1 %v1636_v16  ;;  %v459_v63 = vpop.permute.xlu0 %458  ;;  %v756_v30 = vand.u32 4294901760, %v755_v3 }
 0x155   :  { %v557_v1 = vmax.f32 %v541_v37, 0.0  ;;  %v45_v12 = vpop.permute.xlu1 %44 }
 0x156   :  { %v235_v52 = vadd.f32 %v219_v14, %v45_v12 }
 0x157   :  { %v2176_v41 = vand.u32 4294901760, %v557_v1 }
 0x159   :  { %v2179_v54 = vsub.f32 %v557_v1, %v2176_v41  ;;  %1361 = vmatpush3.msra.mxu0 %v2176_v41  ;;  %v522_v1 = vmul.f32 %v1866_v55, %v459_v63 }
 0x15a   :  { %1362 = vmatprep.subr.mxu0 %v1636_v16  ;;  %v257_v0 = vpop.permute.xlu1 %256 }
 0x15b   :  { %v320_v2 = vmul.f32 %v1858_v53, %v257_v0  ;;  %1363 = vmatpush3.msra.mxu0 %v2169_v40  ;;  %v747_v10 = vand.u32 4294901760, %v2179_v54  ;;  %v220_v0 = vmul.f32 %v1849_v49, %v2141_v46 }
 0x15c   :  { %1364 = vmatprep.subr.mxu0 %v1636_v16 }
 0x15d   :  { %v748_v45 = vsub.f32 %v2179_v54, %v747_v10  ;;  %v336_v29 = vadd.f32 %v320_v2, %v235_v52  ;;  %v236_v52 = vadd.f32 %v220_v0, %v1962_v13  ;;  %v218_v13 = vmul.f32 %v1849_v49, %v1967_v18 }
 0x15f   :  { %v362_v43 = vpop.permute.xlu1 %361  ;;  %v749_v47 = vand.u32 4294901760, %v748_v45  ;;  %v437_v37 = vadd.f32 %v421_v38, %v336_v29  ;;  %v569_v38 = vld [vmem:[%s2420_s3] sm:$0xff]  ;;  %v337_v29 = vadd.f32 %v321_v23, %v236_v52  ;;  %s1638_s3 = smov [#allocation2]  }
 0x160   :  { %v422_v3 = vmul.f32 %v1871_v56, %v362_v43  ;;  %v2207_v63 = vand.u32 4294901760, %v569_v38  ;;  %s1224_s15 = sshll.u32 %s1638_s3, 4  ;;  %s1225_s15 = int_to_ptr.vmem [resolvable:$true] %s1224_s15 }
 0x161   :  { %1396 = vmatpush3.msra.mxu1 %v749_v47  ;;  %v538_v14 = vadd.f32 %v522_v1, %v437_v37  ;;  %s1610_s16 = scalar_lea.vmem %s1225_s15, 128  ;;  %p1615_p1 = scmp.lt.s32.totalorder %s1225_s15, %s1225_s15 }
 0x162   :  { %1397 = vmatprep.subr.mxu1 %v1636_v16  ;;  %v438_v46 = vadd.f32 %v422_v3, %v337_v29  ;;  %v2213_v1 = vsub.f32 %v569_v38, %v2207_v63  ;;  %p1611_p0 = scmp.ne.s32.totalorder %s1225_s15, %s1610_s16  ;;  %p1616_p2 = scmp.lt.s32.totalorder %s1610_s16, %s1610_s16 }
 0x163   :  { %1398 = vmatpush3.msra.mxu1 %v756_v30  ;;  %v554_v45 = vmax.f32 %v538_v14, 0.0 }
 0x164   :  { %v40_v12 = vpop.permute.xlu1 %39  ;;  %1399 = vmatprep.subr.mxu1 %v1636_v16  ;;  %v659_v29 = vand.u32 4294901760, %v2213_v1  ;;  %p1617_p3 = por %p1616_p2, %p1615_p1 }
 0x165   :  { %v2209_v30 = vand.u32 4294901760, %v554_v45  ;;  %v234_v52 = vadd.f32 %v218_v13, %v40_v12 }
 0x166   :  { %p1618_p4 = pnand %p1617_p3, %p1611_p0 }
 0x167   :  { %v2218_v43 = vsub.f32 %v554_v45, %v2209_v30 }
 0x169   :  { %v253_v2 = vpop.permute.xlu1 %252  ;;  %v768_v49 = vand.u32 4294901760, %v2218_v43 }
 0x16a   :  { %v319_v0 = vmul.f32 %v1858_v53, %v253_v2  ;;  %v660_v2 = vsub.f32 %v2213_v1, %v659_v29 }
 0x16c   :  { %v661_v13 = vand.u32 4294901760, %v660_v2 }
 0x16e   :  { %v463_v47 = vpop.permute.xlu1 %462 }
 0x16f   :  { %v523_v37 = vmul.f32 %v1866_v55, %v463_v47  ;;  %v335_v47 = vadd.f32 %v319_v0, %v234_v52 }
 0x171   :  { %v539_v57 = vadd.f32 %v523_v37, %v438_v46  ;;  %v769_v37 = vsub.f32 %v2218_v43, %v768_v49 }
 0x173   :  { %v555_v14 = vmax.f32 %v539_v57, 0.0  ;;  %v354_v23 = vpop.permute.xlu1 %353 }
 0x174   :  { %v420_v3 = vmul.f32 %v1871_v56, %v354_v23 }
 0x175   :  { %v2221_v32 = vand.u32 4294901760, %v555_v14 }
 0x176   :  { %v436_v18 = vadd.f32 %v420_v3, %v335_v47 }
 0x177   :  { %v2226_v38 = vsub.f32 %v555_v14, %v2221_v32  ;;  %1365 = vmatpush3.msra.mxu0 %v2221_v32  ;;  %v770_v14 = vand.u32 4294901760, %v769_v37 }
 0x178   :  { %1366 = vmatprep.subr.mxu0 %v1636_v16  ;;  %v455_v53 = vpop.permute.xlu1 %454 }
 0x179   :  { %v521_v12 = vmul.f32 %v1866_v55, %v455_v53  ;;  %1367 = vmatpush3.msra.mxu0 %v2209_v30  ;;  %v761_v56 = vand.u32 4294901760, %v2226_v38 }
 0x17a   :  { %1368 = vmatprep.subr.mxu0 %v1636_v16 }
 0x17b   :  { %v537_v45 = vadd.f32 %v521_v12, %v436_v18  ;;  %v762_v46 = vsub.f32 %v2226_v38, %v761_v56 }
 0x17d   :  { %v553_v55 = vmax.f32 %v537_v45, 0.0  ;;  %v763_v57 = vand.u32 4294901760, %v762_v46 }
 0x17f   :  { %v2244_v0 = vand.u32 4294901760, %v553_v55  ;;  %1400 = vmatpush3.msra.mxu1 %v763_v57 }
 0x180   :  { %1401 = vmatprep.subr.mxu1 %v1636_v16 }
 0x181   :  { %v2248_v23 = vsub.f32 %v553_v55, %v2244_v0  ;;  %1369 = vmatpush3.msra.mxu0 %v2244_v0  ;;  %1402 = vmatpush3.msra.mxu1 %v770_v14 }
 0x182   :  { %1408 = vmatprep.subr.mxu0 %v1636_v16  ;;  %1371 = vmatmul.mubr.f32.vlgmr.msra.gmra.mxu0 %v661_v13 }
 0x183   :  { %1409 = vmatpush3.msra.mxu0 %v1895_v24  ;;  %1403 = vmatprep.subr.mxu1 %v1636_v16  ;;  %v775_v52 = vand.u32 4294901760, %v2248_v23 }
 0x184   :  { %1410 = vmatprep.subr.mxu0 %v1636_v16  ;;  %1440 = vmatprep.mubr.msk.f32.mxu0 %vm1637_vm0, %v1636_v16 }
 0x185   :  { %1411 = vmatpush3.msra.mxu0 %v1909_v33  ;;  %v776_v3 = vsub.f32 %v2248_v23, %v775_v52 }
 0x186   :  { %1412 = vmatprep.subr.mxu0 %v1636_v16 }
 0x187   :  { %1413 = vmatpush3.msra.mxu0 %v1947_v7  ;;  %v777_v47 = vand.u32 4294901760, %v776_v3 }
 0x188   :  { %1414 = vmatprep.subr.mxu0 %v1636_v16 }
 0x189   :  { %1404 = vmatpush3.msra.mxu1 %v777_v47  ;;  %1415 = vmatpush3.msra.mxu0 %v2001_v25 }
 0x18a   :  { %1406 = vmatmul.mubr.f32.vlgmr.msra.gmra.mxu1 %v2207_v63  ;;  %1416 = vmatprep.subr.mxu0 %v1636_v16 }
 0x18b   :  { %1443 = vmatprep.subr.mxu1 %v1636_v16  ;;  %1417 = vmatpush3.msra.mxu0 %v2021_v50 }
 0x18c   :  { %1444 = vmatpush3.msra.mxu1 %v1886_v19  ;;  %1418 = vmatprep.subr.mxu0 %v1636_v16 }
 0x18d   :  { %1445 = vmatprep.subr.mxu1 %v1636_v16  ;;  %1419 = vmatpush3.msra.mxu0 %v2053_v17 }
 0x18e   :  { %1446 = vmatpush3.msra.mxu1 %v1901_v26  ;;  %1420 = vmatprep.subr.mxu0 %v1636_v16 }
 0x18f   :  { %1447 = vmatprep.subr.mxu1 %v1636_v16  ;;  %1421 = vmatpush3.msra.mxu0 %v2047_v61 }
 0x190   :  { %1448 = vmatpush3.msra.mxu1 %v1943_v6  ;;  %1422 = vmatprep.subr.mxu0 %v1636_v16 }
 0x191   :  { %1449 = vmatprep.subr.mxu1 %v1636_v16  ;;  %1423 = vmatpush3.msra.mxu0 %v2099_v58 }
 0x192   :  { %1450 = vmatpush3.msra.mxu1 %v1997_v36  ;;  %1424 = vmatprep.subr.mxu0 %v1636_v16 }
 0x193   :  { %1451 = vmatprep.subr.mxu1 %v1636_v16  ;;  %1425 = vmatpush3.msra.mxu0 %v2121_v60 }
 0x194   :  { %1452 = vmatpush3.msra.mxu1 %v2015_v42  ;;  %1426 = vmatprep.subr.mxu0 %v1636_v16 }
 0x195   :  { %1453 = vmatprep.subr.mxu1 %v1636_v16  ;;  %1427 = vmatpush3.msra.mxu0 %v2116_v5 }
 0x196   :  { %1454 = vmatpush3.msra.mxu1 %v2050_v34  ;;  %1428 = vmatprep.subr.mxu0 %v1636_v16 }
 0x197   :  { %1455 = vmatprep.subr.mxu1 %v1636_v16  ;;  %1429 = vmatpush3.msra.mxu0 %v2154_v4 }
 0x198   :  { %1456 = vmatpush3.msra.mxu1 %v2041_v44  ;;  %1430 = vmatprep.subr.mxu0 %v1636_v16 }
 0x199   :  { %1457 = vmatprep.subr.mxu1 %v1636_v16  ;;  %1431 = vmatpush3.msra.mxu0 %v2179_v54 }
 0x19a   :  { %1458 = vmatpush3.msra.mxu1 %v2096_v9  ;;  %1432 = vmatprep.subr.mxu0 %v1636_v16 }
 0x19b   :  { %1459 = vmatprep.subr.mxu1 %v1636_v16  ;;  %1433 = vmatpush3.msra.mxu0 %v2174_v39 }
 0x19c   :  { %1460 = vmatpush3.msra.mxu1 %v2118_v59  ;;  %1434 = vmatprep.subr.mxu0 %v1636_v16 }
 0x19d   :  { %1461 = vmatprep.subr.mxu1 %v1636_v16  ;;  %1435 = vmatpush3.msra.mxu0 %v2226_v38 }
 0x19e   :  { %1462 = vmatpush3.msra.mxu1 %v2111_v62  ;;  %1436 = vmatprep.subr.mxu0 %v1636_v16 }
 0x19f   :  { %1463 = vmatprep.subr.mxu1 %v1636_v16  ;;  %1437 = vmatpush3.msra.mxu0 %v2218_v43 }
 0x1a0   :  { %1464 = vmatpush3.msra.mxu1 %v2151_v48  ;;  %1438 = vmatprep.subr.mxu0 %v1636_v16 }
 0x1a1   :  { %1465 = vmatprep.subr.mxu1 %v1636_v16  ;;  %1439 = vmatpush3.msra.mxu0 %v2248_v23 }
 0x1a2   :  { %1466 = vmatpush3.msra.mxu1 %v2176_v41  ;;  %1441 = vmatmul.mubr.f32.vlgmr.msra.gmra.mxu0 %v2213_v1 }
 0x1a3   :  { %1467 = vmatprep.subr.mxu1 %v1636_v16  ;;  %1478 = vmatprep.subr.mxu0 %v1636_v16 }
 0x1a4   :  { %1468 = vmatpush3.msra.mxu1 %v2169_v40  ;;  %1479 = vmatpush3.msra.mxu0 %v670_v28 }
 0x1a5   :  { %1469 = vmatprep.subr.mxu1 %v1636_v16  ;;  %1480 = vmatprep.subr.mxu0 %v1636_v16 }
 0x1a6   :  { %1470 = vmatpush3.msra.mxu1 %v2221_v32  ;;  %1481 = vmatpush3.msra.mxu0 %v677_v51 }
 0x1a7   :  { %1471 = vmatprep.subr.mxu1 %v1636_v16  ;;  %1482 = vmatprep.subr.mxu0 %v1636_v16 }
 0x1a8   :  { %1472 = vmatpush3.msra.mxu1 %v2209_v30  ;;  %1483 = vmatpush3.msra.mxu0 %v684_v11 }
 0x1a9   :  { %1473 = vmatprep.subr.mxu1 %v1636_v16  ;;  %1484 = vmatprep.subr.mxu0 %v1636_v16 }
 0x1aa   :  { %1474 = vmatpush3.msra.mxu1 %v2244_v0  ;;  %1475 = vmatprep.mubr.msk.f32.mxu1 %vm1637_vm0, %v1636_v16 }
 0x1ab   :  { %1485 = vmatpush3.msra.mxu0 %v691_v21  ;;  %1476 = vmatmul.mubr.f32.vlgmr.msra.gmra.mxu1 %v659_v29 }
 0x1ac   :  { %1486 = vmatprep.subr.mxu0 %v1636_v16  ;;  %1513 = vmatprep.subr.mxu1 %v1636_v16 }
 0x1ad   :  { %1487 = vmatpush3.msra.mxu0 %v698_v31  ;;  %1514 = vmatpush3.msra.mxu1 %v1886_v19  ;;  %v2424_v19 = vand.u32 4294901760, %v2174_v39 }
 0x1ae   :  { %1488 = vmatprep.subr.mxu0 %v1636_v16  ;;  %1515 = vmatprep.subr.mxu1 %v1636_v16 }
 0x1af   :  { %1489 = vmatpush3.msra.mxu0 %v705_v35  ;;  %1516 = vmatpush3.msra.mxu1 %v1901_v26 }
 0x1b0   :  { %1490 = vmatprep.subr.mxu0 %v1636_v16  ;;  %1517 = vmatprep.subr.mxu1 %v1636_v16 }
 0x1b1   :  { %1491 = vmatpush3.msra.mxu0 %v712_v22  ;;  %1518 = vmatpush3.msra.mxu1 %v1943_v6 }
 0x1b2   :  { %1492 = vmatprep.subr.mxu0 %v1636_v16  ;;  %1519 = vmatprep.subr.mxu1 %v1636_v16 }
 0x1b3   :  { %1493 = vmatpush3.msra.mxu0 %v719_v15  ;;  %1520 = vmatpush3.msra.mxu1 %v1997_v36  ;;  %v574_v36 = vpop.permute.xlu1 %573 }
 0x1b4   :  { %1494 = vmatprep.subr.mxu0 %v1636_v16  ;;  %1521 = vmatprep.subr.mxu1 %v1636_v16 }
 0x1b5   :  { %1495 = vmatpush3.msra.mxu0 %v726_v8  ;;  %1522 = vmatpush3.msra.mxu1 %v2015_v42 }
 0x1b6   :  { %1496 = vmatprep.subr.mxu0 %v1636_v16  ;;  %1523 = vmatprep.subr.mxu1 %v1636_v16 }
 0x1b7   :  { %1497 = vmatpush3.msra.mxu0 %v733_v20  ;;  %1524 = vmatpush3.msra.mxu1 %v2050_v34 }
 0x1b8   :  { %1498 = vmatprep.subr.mxu0 %v1636_v16  ;;  %1525 = vmatprep.subr.mxu1 %v1636_v16 }
 0x1b9   :  { %1499 = vmatpush3.msra.mxu0 %v740_v27  ;;  %1526 = vmatpush3.msra.mxu1 %v2041_v44 }
 0x1ba   :  { %1500 = vmatprep.subr.mxu0 %v1636_v16  ;;  %1527 = vmatprep.subr.mxu1 %v1636_v16 }
 0x1bb   :  { %1501 = vmatpush3.msra.mxu0 %v747_v10  ;;  %1528 = vmatpush3.msra.mxu1 %v2096_v9 }
 0x1bc   :  { %1502 = vmatprep.subr.mxu0 %v1636_v16  ;;  %1529 = vmatprep.subr.mxu1 %v1636_v16 }
 0x1bd   :  { %1503 = vmatpush3.msra.mxu0 %v2424_v19  ;;  %1530 = vmatpush3.msra.mxu1 %v2118_v59 }
 0x1be   :  { %1504 = vmatprep.subr.mxu0 %v1636_v16  ;;  %1531 = vmatprep.subr.mxu1 %v1636_v16 }
 0x1bf   :  { %1505 = vmatpush3.msra.mxu0 %v761_v56  ;;  %1532 = vmatpush3.msra.mxu1 %v2111_v62 }
 0x1c0   :  { %1506 = vmatprep.subr.mxu0 %v1636_v16  ;;  %1533 = vmatprep.subr.mxu1 %v1636_v16 }
 0x1c1   :  { %1507 = vmatpush3.msra.mxu0 %v768_v49  ;;  %1534 = vmatpush3.msra.mxu1 %v2151_v48 }
 0x1c2   :  { %1508 = vmatprep.subr.mxu0 %v1636_v16  ;;  %1535 = vmatprep.subr.mxu1 %v1636_v16 }
 0x1c3   :  { %1509 = vmatpush3.msra.mxu0 %v775_v52  ;;  %1510 = vmatprep.mubr.msk.f32.mxu0 %vm1637_vm0, %v1636_v16 }
 0x1c4   :  { %1536 = vmatpush3.msra.mxu1 %v2176_v41  ;;  %1511 = vmatmul.mubr.f32.vlgmr.msra.gmra.mxu0 %v2207_v63 }
 0x1c5   :  { %1537 = vmatprep.subr.mxu1 %v1636_v16  ;;  %1545 = vmatprep.mubr.msk.f32.mxu1 %vm1637_vm0, %v1636_v16 }
 0x1c6   :  { %1538 = vmatpush3.msra.mxu1 %v2169_v40 }
 0x1c7   :  { %1539 = vmatprep.subr.mxu1 %v1636_v16 }
 0x1c8   :  { %1540 = vmatpush3.msra.mxu1 %v2221_v32 }
 0x1c9   :  { %1541 = vmatprep.subr.mxu1 %v1636_v16 }
 0x1ca   :  { %1542 = vmatpush3.msra.mxu1 %v2209_v30 }
 0x1cb   :  { %1543 = vmatprep.subr.mxu1 %v1636_v16 }
 0x1cc   :  { %1544 = vmatpush3.msra.mxu1 %v2244_v0 }
 0x1cd   :  { %1546 = vmatmul.mubr.f32.vlgmr.msra.gmra.mxu1 %v2207_v63 }
 0x242   :  { %v663_v24 = vpop.f32.mrf.mxu0 }
 0x243   :  { %v664_v25 = vadd.f32 %v663_v24, %v574_v36 }
 0x244   :  { %v1372_v26 = vpop.f32.mrf.mxu0 }
 0x24a   :  { %v814_v28 = vpop.f32.mrf.mxu1 }
 0x24b   :  { %v815_v42 = vadd.f32 %v814_v28, %v664_v25 }
 0x24c   :  { %v1407_v33 = vpop.f32.mrf.mxu1 }
 0x262   :  { %v918_v51 = vpop.f32.mrf.mxu0 }
 0x263   :  { %v919_v31 = vadd.f32 %v918_v51, %v815_v42 }
 0x264   :  { %v1442_v6 = vpop.f32.mrf.mxu0 }
 0x26b   :  { %v1007_v7 = vpop.f32.mrf.mxu1 }
 0x26c   :  { %v1008_v44 = vadd.f32 %v1007_v7, %v919_v31 }
 0x26d   :  { %v1477_v11 = vpop.f32.mrf.mxu1 }
 0x284   :  { %v1126_v21 = vpop.f32.mrf.mxu0 }
 0x285   :  { %v1127_v16 = vadd.f32 %v1126_v21, %v1008_v44 }
 0x286   :  { %v1512_v50 = vpop.f32.mrf.mxu0 }
 0x28d   :  { %v1213_v61 = vpop.f32.mrf.mxu1 }
 0x28e   :  { %v1214_v34 = vadd.f32 %v1213_v61, %v1127_v16 }
 0x28f   :  { %v1547_v17 = vpop.f32.mrf.mxu1 }
 0x290   :  { %1217 = vst [vmem:[#allocation2] sm:$0xff] %v1214_v34 }
 0x291   :  { %1621 = shalt.err (!%p1618_p4)
}
 0x292   :  { %1227 = dma.vmem_to_hbm [thread:$0]  %s1225_s15, 128, %s2422_s5, [#allocation3]  }
 0x293   :  { %1630 = dma.done.wait [#allocation3], 128  }
 0x294   :  { %1631 = vsyncadd [#allocation3], 4294967168 }
 0x295   :  { %1231 = vsyncpa [#allocation3], 1 }

</bundles_post_ra>
